<compile_context>
chip_gen: v5e
topology: v5e:2x2
jax: 0.10.0
libtpu: 0.0.40
codegen_flags: <defaults>
</compile_context>

<pallas_src>
import functools
import math

import jax
import jax.numpy as jnp
from jax.experimental import pallas as pl
from jax.experimental.pallas import tpu as pltpu

LANE = 128      # lane width (last dim)
F32 = 4
BF16 = 2


def _cdiv(a, b):
    return (a + b - 1) // b


def _round_up(x, m):
    return _cdiv(x, m) * m


def _vmem_capacity_bytes():
    """Physical VMEM per TensorCore (128 MiB v5e/v6e, 64 MiB v7x)."""
    try:
        info = pltpu.get_tpu_info()
        cap = getattr(info, "vmem_capacity_bytes", None)
        if cap:
            return int(cap)
    except Exception:
        pass
    return 64 << 20   # conservative (v7x-safe) fallback


# --------------------------------------------------------------------------
# Kernel: the whole (sub-)network in one body.  Intermediate activations live
# in VMEM/vregs only; weights are VMEM-resident across batch tiles.
# --------------------------------------------------------------------------
def _fused_mlp_kernel(*refs, num_layers):
    """refs = (x_ref, w0, b0, w1, b1, ..., o_ref)
       x_ref : (Bt, K0)  f32   (batch tile, lane-padded features)
       wl    : (Kl, Nl)  bf16  (pre-transposed, zero-padded, batch-invariant)
       bl    : (1,  Nl)  f32
       o_ref : (Bt, NL)  f32
    """
    x_ref = refs[0]
    o_ref = refs[-1]
    h = x_ref[...].astype(jnp.float32)
    for l in range(num_layers):
        w = refs[1 + 2 * l][...]                       # bf16 (K, N)
        b = refs[2 + 2 * l][...]                       # f32  (1, N)
        y = jnp.dot(h.astype(jnp.bfloat16), w,
                    preferred_element_type=jnp.float32) + b
        h = jnp.maximum(y, 0.0)                        # activation == ReLU
    o_ref[...] = h.astype(o_ref.dtype)


def _fused_group_call(xp, layers, *, bt, vmem_cap):
    """One pallas_call running a consecutive group of layers fused."""
    batch_pad, k_pad = xp.shape
    n_last = layers[-1][0].shape[1]
    num_layers = len(layers)
    nt = batch_pad // bt

    in_specs = [pl.BlockSpec((bt, k_pad), lambda i: (i, 0))]
    for wt, bp in layers:
        kp, np_ = wt.shape
        # Constant index_map -> weights stay resident across batch tiles.
        # (Default double-buffering is charged 2x in the VMEM budget below;
        #  pl.Buffered(1) would halve it but we keep the safe default.)
        in_specs.append(pl.BlockSpec((kp, np_), lambda i: (0, 0)))
        in_specs.append(pl.BlockSpec((1, np_), lambda i: (0, 0)))
    out_spec = pl.BlockSpec((bt, n_last), lambda i: (i, 0))

    # Explicit VMEM budget, capped by physical capacity (generation-aware).
    weight_bytes = sum(2 * (wt.size * BF16 + bp.size * F32) for wt, bp in layers)
    max_n = max(wt.shape[1] for wt, _ in layers)
    act_bytes = 2 * (bt * k_pad + bt * n_last) * F32          # double-buffered tiles
    interm_bytes = num_layers * bt * max_n * F32              # unrolled per-layer h
    vmem_limit = int(min(max(weight_bytes + act_bytes + interm_bytes + (4 << 20),
                             16 << 20),
                         vmem_cap))

    kernel = functools.partial(_fused_mlp_kernel, num_layers=num_layers)
    return pl.pallas_call(
        kernel,
        out_shape=jax.ShapeDtypeStruct((batch_pad, n_last), jnp.float32),
        grid_spec=pl.GridSpec(
            grid=(nt,),
            in_specs=in_specs,
            out_specs=out_spec,
        ),
        compiler_params=pltpu.CompilerParams(
            dimension_semantics=("parallel",),
            vmem_limit_bytes=vmem_limit,
        ),
    )(xp, *[t for pair in layers for t in pair])


# --------------------------------------------------------------------------
# Host-side one-time preprocessing (NOT inside jit): transpose (out,in)->(K,N),
# zero-pad feature dims to lane multiples, cast weights to bf16.
# Zero padding is exact: padded columns stay 0 through Linear+ReLU.
# --------------------------------------------------------------------------
def preprocess_params(params):
    in_f = params[0][0].shape[1]
    out_f = params[-1][0].shape[0]
    k_pad = _round_up(in_f, LANE)
    prepped = []
    for (w, b) in params:                              # w: (out, in) PyTorch layout
        n, k = w.shape
        n_pad = _round_up(n, LANE)
        wt = (jnp.zeros((k_pad, n_pad), jnp.float32)
              .at[:k, :n].set(jnp.asarray(w, jnp.float32).T)
              .astype(jnp.bfloat16))
        bp = jnp.zeros((1, n_pad), jnp.float32).at[0, :n].set(
            jnp.asarray(b, jnp.float32))
        prepped.append((wt, bp))
        k_pad = n_pad
    return tuple(prepped), in_f, out_f


def _pick_batch_tile(batch, batch_tile):
    """Tile count first, then tile size (128/256-multiple) minimizing padding.
    Ensures >= 2 tiles when there is enough work so both v7x TCs get a share."""
    nt = max(1, _cdiv(batch, batch_tile))
    if nt == 1 and batch > 2 * LANE:
        nt = 2
    c128 = _round_up(_cdiv(batch, nt), 128)
    c256 = _round_up(_cdiv(batch, nt), 256)
    pad128 = _cdiv(batch, c128) * c128
    pad256 = _cdiv(batch, c256) * c256
    bt = c256 if pad256 <= pad128 else c128            # prefer 256-high MXU fill
    nt = _cdiv(batch, bt)
    return bt, nt * bt


def dpdnet_fused(x, prepped, *, out_f, batch_tile=1024):
    """Whole DPDNet forward; normally a single fused pallas_call."""
    batch, in_f = x.shape
    in_pad = prepped[0][0].shape[0]
    out_pad = prepped[-1][0].shape[1]
    max_n_pad = max(wt.shape[1] for wt, _ in prepped)

    bt, batch_pad = _pick_batch_tile(batch, batch_tile)

    xp = x.astype(jnp.float32)
    if (batch_pad, in_pad) != (batch, in_f):
        xp = jnp.zeros((batch_pad, in_pad), jnp.float32).at[:batch, :in_f].set(xp)

    vmem_cap = int(0.75 * _vmem_capacity_bytes())

    # Split layers into groups whose resident (2x-buffered) weights fit VMEM.
    # Typical nets -> one group -> one fused pallas_call (no HBM intermediates).
    fixed_est = (2 * (bt * in_pad + bt * out_pad) * F32
                 + len(prepped) * bt * max_n_pad * F32 + (4 << 20))
    groups, cur, cur_bytes = [], [], 0
    for layer in prepped:
        wt, bp = layer
        lb = 2 * (wt.size * BF16 + bp.size * F32)
        if cur and (fixed_est + cur_bytes + lb > vmem_cap):
            groups.append(cur)
            cur, cur_bytes = [], 0
        cur.append(layer)
        cur_bytes += lb
    groups.append(cur)

    h = xp
    for g in groups:
        h = _fused_group_call(h, g, bt=bt, vmem_cap=vmem_cap)
    return h[:batch, :out_f]


@functools.partial(jax.jit, static_argnames=("out_f", "batch_tile"))
def dpdnet_forward(x, prepped, *, out_f, batch_tile=1024):
    return dpdnet_fused(x, prepped, out_f=out_f, batch_tile=batch_tile)


# --------------------------------------------------------------------------
# Init + references
# --------------------------------------------------------------------------
def init_dpdnet_params(key, input_size, output_size, hidden_layers):
    """Deterministic init matching nn.Linear default (uniform +-1/sqrt(fan_in))."""
    sizes = [input_size] + list(hidden_layers) + [output_size]
    params = []
    for i in range(len(sizes) - 1):
        fan_in, fan_out = sizes[i], sizes[i + 1]
        key, kw, kb = jax.random.split(key, 3)
        bound = 1.0 / math.sqrt(fan_in)
        w = jax.random.uniform(kw, (fan_out, fan_in), jnp.float32, -bound, bound)
        b = jax.random.uniform(kb, (fan_out,), jnp.float32, -bound, bound)
        params.append((w, b))
    return tuple(params)


def dpdnet_forward_ref_f32(x, params):
    """Pure-f32 reference (module semantics)."""
    for w, b in params:
        x = jnp.maximum(x @ w.T + b, 0.0)
    return x


def dpdnet_forward_ref_bf16(x, params):
    """Reference with the same bf16-operand / f32-accumulate matmul as the kernel."""
    for w, b in params:
        y = jnp.dot(x.astype(jnp.bfloat16),
                    w.astype(jnp.bfloat16).T,
                    preferred_element_type=jnp.float32) + b
        x = jnp.maximum(y, 0.0)
    return x


if __name__ == "__main__":
    key = jax.random.PRNGKey(0)
    key, kx = jax.random.split(key)

    batch = 8
    input_size = 32
    hidden_layers = [64, 48]
    output_size = 16

    x = jax.random.normal(kx, (batch, input_size), jnp.float32)
    params = init_dpdnet_params(key, input_size, output_size, hidden_layers)

    # One-time preprocessing (transpose / pad / bf16-cast) outside the jit.
    prepped, in_f, out_f = preprocess_params(params)

    out = dpdnet_forward(x, prepped, out_f=out_f)
    out = jax.block_until_ready(out)

    assert out.shape == (batch, output_size), out.shape

    ref_bf16 = dpdnet_forward_ref_bf16(x, params)
    assert jnp.allclose(out, ref_bf16, atol=1e-3, rtol=1e-3), \
        "mismatch vs bf16-matmul reference"

    ref_f32 = dpdnet_forward_ref_f32(x, params)
    assert jnp.allclose(out, ref_f32, atol=3e-2, rtol=3e-2), \
        "mismatch vs f32 reference (beyond expected bf16 error)"

    print("KERNEL_OK")
</pallas_src>

<mosaic_0001>
module attributes {stable_mosaic.version = 11 : i64} {
  func.func @_fused_mlp_kernel(%arg0: i32, %arg1: memref<128x128xf32, #tpu.memory_space<vmem>>, %arg2: memref<128x128xbf16, #tpu.memory_space<vmem>>, %arg3: memref<1x128xf32, #tpu.memory_space<vmem>>, %arg4: memref<128x128xbf16, #tpu.memory_space<vmem>>, %arg5: memref<1x128xf32, #tpu.memory_space<vmem>>, %arg6: memref<128x128xbf16, #tpu.memory_space<vmem>>, %arg7: memref<1x128xf32, #tpu.memory_space<vmem>>, %arg8: memref<128x128xf32, #tpu.memory_space<vmem>>) attributes {dimension_semantics = [#tpu.dimension_semantics<parallel>], iteration_bounds = array<i64: 1>, scalar_prefetch = 0 : i64, scratch_operands = 0 : i64, tpu.core_type = #tpu.core_type<tc>, window_params = [{transform_indices = @transform_0, window_bounds = array<i64: 128, 128>}, {pipeline_mode = #tpu.pipeline_mode<synchronous>, transform_indices = @transform_1, window_bounds = array<i64: 128, 128>}, {pipeline_mode = #tpu.pipeline_mode<synchronous>, transform_indices = @transform_2, window_bounds = array<i64: 1, 128>}, {pipeline_mode = #tpu.pipeline_mode<synchronous>, transform_indices = @transform_3, window_bounds = array<i64: 128, 128>}, {pipeline_mode = #tpu.pipeline_mode<synchronous>, transform_indices = @transform_4, window_bounds = array<i64: 1, 128>}, {pipeline_mode = #tpu.pipeline_mode<synchronous>, transform_indices = @transform_5, window_bounds = array<i64: 128, 128>}, {pipeline_mode = #tpu.pipeline_mode<synchronous>, transform_indices = @transform_6, window_bounds = array<i64: 1, 128>}, {transform_indices = @transform_7, window_bounds = array<i64: 128, 128>}]} {
    %c0 = arith.constant 0 : index
    %c0_0 = arith.constant 0 : index
    %0 = vector.load %arg1[%c0, %c0_0] : memref<128x128xf32, #tpu.memory_space<vmem>>, vector<128x128xf32>
    %c0_1 = arith.constant 0 : index
    %c0_2 = arith.constant 0 : index
    %1 = vector.load %arg2[%c0_1, %c0_2] : memref<128x128xbf16, #tpu.memory_space<vmem>>, vector<128x128xbf16>
    %c0_3 = arith.constant 0 : index
    %c0_4 = arith.constant 0 : index
    %2 = vector.load %arg3[%c0_3, %c0_4] : memref<1x128xf32, #tpu.memory_space<vmem>>, vector<1x128xf32>
    %3 = arith.truncf %0 : vector<128x128xf32> to vector<128x128xbf16>
    %cst = arith.constant dense<0.000000e+00> : vector<128x128xf32>
    %4 = tpu.matmul %3, %1, %cst {dimension_numbers = #tpu.dot_dimension_numbers<[1], [0], [0], [1], [0, 0, 1, 1], [], []>} : vector<128x128xbf16>, vector<128x128xbf16>, vector<128x128xf32> -> vector<128x128xf32>
    %5 = vector.broadcast %2 : vector<1x128xf32> to vector<128x128xf32>
    %6 = arith.addf %4, %5 : vector<128x128xf32>
    %cst_5 = arith.constant 0.000000e+00 : f32
    %7 = vector.broadcast %cst_5 : f32 to vector<128x128xf32>
    %8 = arith.maximumf %6, %7 : vector<128x128xf32>
    %c0_6 = arith.constant 0 : index
    %c0_7 = arith.constant 0 : index
    %9 = vector.load %arg4[%c0_6, %c0_7] : memref<128x128xbf16, #tpu.memory_space<vmem>>, vector<128x128xbf16>
    %c0_8 = arith.constant 0 : index
    %c0_9 = arith.constant 0 : index
    %10 = vector.load %arg5[%c0_8, %c0_9] : memref<1x128xf32, #tpu.memory_space<vmem>>, vector<1x128xf32>
    %11 = arith.truncf %8 : vector<128x128xf32> to vector<128x128xbf16>
    %cst_10 = arith.constant dense<0.000000e+00> : vector<128x128xf32>
    %12 = tpu.matmul %11, %9, %cst_10 {dimension_numbers = #tpu.dot_dimension_numbers<[1], [0], [0], [1], [0, 0, 1, 1], [], []>} : vector<128x128xbf16>, vector<128x128xbf16>, vector<128x128xf32> -> vector<128x128xf32>
    %13 = vector.broadcast %10 : vector<1x128xf32> to vector<128x128xf32>
    %14 = arith.addf %12, %13 : vector<128x128xf32>
    %cst_11 = arith.constant 0.000000e+00 : f32
    %15 = vector.broadcast %cst_11 : f32 to vector<128x128xf32>
    %16 = arith.maximumf %14, %15 : vector<128x128xf32>
    %c0_12 = arith.constant 0 : index
    %c0_13 = arith.constant 0 : index
    %17 = vector.load %arg6[%c0_12, %c0_13] : memref<128x128xbf16, #tpu.memory_space<vmem>>, vector<128x128xbf16>
    %c0_14 = arith.constant 0 : index
    %c0_15 = arith.constant 0 : index
    %18 = vector.load %arg7[%c0_14, %c0_15] : memref<1x128xf32, #tpu.memory_space<vmem>>, vector<1x128xf32>
    %19 = arith.truncf %16 : vector<128x128xf32> to vector<128x128xbf16>
    %cst_16 = arith.constant dense<0.000000e+00> : vector<128x128xf32>
    %20 = tpu.matmul %19, %17, %cst_16 {dimension_numbers = #tpu.dot_dimension_numbers<[1], [0], [0], [1], [0, 0, 1, 1], [], []>} : vector<128x128xbf16>, vector<128x128xbf16>, vector<128x128xf32> -> vector<128x128xf32>
    %21 = vector.broadcast %18 : vector<1x128xf32> to vector<128x128xf32>
    %22 = arith.addf %20, %21 : vector<128x128xf32>
    %cst_17 = arith.constant 0.000000e+00 : f32
    %23 = vector.broadcast %cst_17 : f32 to vector<128x128xf32>
    %24 = arith.maximumf %22, %23 : vector<128x128xf32>
    %c0_18 = arith.constant 0 : index
    %c0_19 = arith.constant 0 : index
    %25 = vector.load %arg8[%c0_18, %c0_19] : memref<128x128xf32, #tpu.memory_space<vmem>>, vector<128x128xf32>
    tpu.vector_store %arg8[%c0_18, %c0_19], %24 {strides = array<i32>} : memref<128x128xf32, #tpu.memory_space<vmem>>, vector<128x128xf32>,
    return
  }
  func.func @transform_0(%arg0: i32) -> (i32, i32) {
    %c0_i32 = arith.constant 0 : i32
    %c0_i32_0 = arith.constant 0 : i32
    return %arg0, %c0_i32 : i32, i32
  }
  func.func @transform_1(%arg0: i32) -> (i32, i32) {
    %c0_i32 = arith.constant 0 : i32
    %c0_i32_0 = arith.constant 0 : i32
    %c0_i32_1 = arith.constant 0 : i32
    return %c0_i32, %c0_i32_0 : i32, i32
  }
  func.func @transform_2(%arg0: i32) -> (i32, i32) {
    %c0_i32 = arith.constant 0 : i32
    %c0_i32_0 = arith.constant 0 : i32
    %c0_i32_1 = arith.constant 0 : i32
    return %c0_i32, %c0_i32_0 : i32, i32
  }
  func.func @transform_3(%arg0: i32) -> (i32, i32) {
    %c0_i32 = arith.constant 0 : i32
    %c0_i32_0 = arith.constant 0 : i32
    %c0_i32_1 = arith.constant 0 : i32
    return %c0_i32, %c0_i32_0 : i32, i32
  }
  func.func @transform_4(%arg0: i32) -> (i32, i32) {
    %c0_i32 = arith.constant 0 : i32
    %c0_i32_0 = arith.constant 0 : i32
    %c0_i32_1 = arith.constant 0 : i32
    return %c0_i32, %c0_i32_0 : i32, i32
  }
  func.func @transform_5(%arg0: i32) -> (i32, i32) {
    %c0_i32 = arith.constant 0 : i32
    %c0_i32_0 = arith.constant 0 : i32
    %c0_i32_1 = arith.constant 0 : i32
    return %c0_i32, %c0_i32_0 : i32, i32
  }
  func.func @transform_6(%arg0: i32) -> (i32, i32) {
    %c0_i32 = arith.constant 0 : i32
    %c0_i32_0 = arith.constant 0 : i32
    %c0_i32_1 = arith.constant 0 : i32
    return %c0_i32, %c0_i32_0 : i32, i32
  }
  func.func @transform_7(%arg0: i32) -> (i32, i32) {
    %c0_i32 = arith.constant 0 : i32
    %c0_i32_0 = arith.constant 0 : i32
    return %arg0, %c0_i32 : i32, i32
  }
}

</mosaic_0001>

<bundles_post_ra>
// kernel: dpdnet_forward.1
= control target key start
LH: loop header
LB: loop body
LE: loop exit
PB: predicated region body
PF: predicated region fallthrough
CT: control target
= control target key end

     0   :  { %12 = vsyncpa [#allocation3], 0  ;;  %s678_s27 = smov [#allocation2]   ;;  %s679_s29 = smov 64   ;;  %s895_s0 = inlined_call_operand.vmem [shape: f32[128,128], index: 0, kind: input, shape index: {}]   ;;  %s896_s1 = inlined_call_operand.vmem [shape: bf16[128,128], index: 1, kind: input, shape index: {}]   ;;  %s897_s2 = inlined_call_operand.vmem [shape: f32[1,128], index: 2, kind: input, shape index: {}]   ;;  %s898_s3 = inlined_call_operand.vmem [shape: bf16[128,128], index: 3, kind: input, shape index: {}]   ;;  %s899_s4 = inlined_call_operand.vmem [shape: f32[1,128], index: 4, kind: input, shape index: {}]   ;;  %s900_s5 = inlined_call_operand.hbm [shape: bf16[128,128], index: 5, kind: input, shape index: {}]   ;;  %s901_s6 = inlined_call_operand.vmem [shape: f32[1,128], index: 6, kind: input, shape index: {}]   ;;  %s902_s7 = inlined_call_operand.vmem [shape: f32[128,128], index: 7, kind: output, shape index: {}]  }
   0x1   :  { %s27_s26 = sshll.u32 %s900_s5, 4  ;;  %s29_s28 = sshll.u32 %s678_s27, 4  ;;  %s28_s26 = int_to_ptr.hbm [resolvable:$true] %s27_s26  ;;  %s30_s28 = int_to_ptr.vmem [resolvable:$true] %s29_s28 }
   0x2   :  { %s680_s30 = smov 4  }
   0x3   :  { %35 = dma.hbm_to_vmem [thread:$0]  %s28_s26, 1024, %s30_s28, [#allocation3], %s679_s29, %s679_s29, %s680_s30  }
   0x4   :  { %676 = dma.done.wait [#allocation3], 1024  }
   0x5   :  { %677 = vsyncadd [#allocation3], 4294966272  ;;  %v605_v0 = vld [vmem:[%s896_s1 + $0x38] sm:$0xff]  ;;  %v604_v1 = vld [vmem:[%s896_s1 + $0x30] sm:$0xff] }
   0x6   :  { %134 = vmatpush.bf16.msra.mxu0 %v605_v0  ;;  %622 = vmatpush.bf16.msra.mxu3 %v605_v0  ;;  %v603_v2 = vld [vmem:[%s896_s1 + $0x28] sm:$0xff]  ;;  %v602_v3 = vld [vmem:[%s896_s1 + $0x20] sm:$0xff]  ;;  %v601_v4 = vld [vmem:[%s896_s1 + $0x18] sm:$0xff] }
   0x7   :  { %v600_v5 = vld [vmem:[%s896_s1 + $0x10] sm:$0xff]  ;;  %v599_v6 = vld [vmem:[%s896_s1 + $0x8] sm:$0xff]  ;;  %v598_v7 = vld [vmem:[%s896_s1] sm:$0xff] }
   0x8   :  { %v42_v8 = vld [vmem:[%s895_s0] sm:$0xff]  ;;  %v43_v9 = vld [vmem:[%s895_s0 + $0x8] sm:$0xff]  ;;  %v44_v14 = vld [vmem:[%s895_s0 + $0x10] sm:$0xff] }
   0x9   :  { %v54_v10 = vld [vmem:[%s895_s0 + $0x60] sm:$0xff]  ;;  %v55_v11 = vld [vmem:[%s895_s0 + $0x68] sm:$0xff]  ;;  %v75_v12 = vpack.c.bf16 %v43_v9, %v42_v8  ;;  %v45_v15 = vld [vmem:[%s895_s0 + $0x18] sm:$0xff] }
   0xa   :  { %135 = vmatpush.bf16.msra.mxu0 %v604_v1  ;;  %623 = vmatpush.bf16.msra.mxu3 %v604_v1  ;;  %v81_v13 = vpack.c.bf16 %v55_v11, %v54_v10  ;;  %v56_v16 = vld [vmem:[%s895_s0 + $0x70] sm:$0xff]  ;;  %v57_v17 = vld [vmem:[%s895_s0 + $0x78] sm:$0xff]  ;;  %v76_v18 = vpack.c.bf16 %v45_v15, %v44_v14  ;;  %v46_v20 = vld [vmem:[%s895_s0 + $0x20] sm:$0xff] }
   0xb   :  { %v82_v19 = vpack.c.bf16 %v57_v17, %v56_v16  ;;  %v47_v21 = vld [vmem:[%s895_s0 + $0x28] sm:$0xff]  ;;  %v48_v23 = vld [vmem:[%s895_s0 + $0x30] sm:$0xff]  ;;  %v49_v24 = vld [vmem:[%s895_s0 + $0x38] sm:$0xff] }
   0xc   :  { %v77_v22 = vpack.c.bf16 %v47_v21, %v46_v20  ;;  %v78_v25 = vpack.c.bf16 %v49_v24, %v48_v23  ;;  %v613_v26 = vld [vmem:[%s898_s3 + $0x38] sm:$0xff]  ;;  %v612_v27 = vld [vmem:[%s898_s3 + $0x30] sm:$0xff]  ;;  %v611_v28 = vld [vmem:[%s898_s3 + $0x28] sm:$0xff] }
   0xd   :  { %275 = vmatpush.bf16.msra.mxu1 %v613_v26  ;;  %v50_v29 = vld [vmem:[%s895_s0 + $0x40] sm:$0xff]  ;;  %v51_v30 = vld [vmem:[%s895_s0 + $0x48] sm:$0xff]  ;;  %v52_v33 = vld [vmem:[%s895_s0 + $0x50] sm:$0xff] }
   0xe   :  { %136 = vmatpush.bf16.msra.mxu0 %v603_v2  ;;  %624 = vmatpush.bf16.msra.mxu3 %v603_v2  ;;  %v610_v31 = vld [vmem:[%s898_s3 + $0x20] sm:$0xff]  ;;  %v79_v32 = vpack.c.bf16 %v51_v30, %v50_v29  ;;  %v53_v34 = vld [vmem:[%s895_s0 + $0x58] sm:$0xff]  ;;  %v608_v37 = vld [vmem:[%s898_s3 + $0x10] sm:$0xff] }
   0xf   :  { %v80_v35 = vpack.c.bf16 %v53_v34, %v52_v33  ;;  %v609_v36 = vld [vmem:[%s898_s3 + $0x18] sm:$0xff]  ;;  %v607_v38 = vld [vmem:[%s898_s3 + $0x8] sm:$0xff]  ;;  %v606_v39 = vld [vmem:[%s898_s3] sm:$0xff] }
  0x10   :  { %v823_v41 = vld [vmem:[%s897_s2] ss:$0 sm:$0xff]  ;;  %v620_v21 = vld [vmem:[#allocation2 + $0x30] sm:$0xff] }
  0x11   :  { %276 = vmatpush.bf16.msra.mxu1 %v612_v27 }
  0x12   :  { %137 = vmatpush.bf16.msra.mxu0 %v602_v3  ;;  %625 = vmatpush.bf16.msra.mxu3 %v602_v3 }
  0x15   :  { %277 = vmatpush.bf16.msra.mxu1 %v611_v28 }
  0x16   :  { %138 = vmatpush.bf16.msra.mxu0 %v601_v4  ;;  %626 = vmatpush.bf16.msra.mxu3 %v601_v4 }
  0x19   :  { %278 = vmatpush.bf16.msra.mxu1 %v610_v31 }
  0x1a   :  { %139 = vmatpush.bf16.msra.mxu0 %v600_v5  ;;  %627 = vmatpush.bf16.msra.mxu3 %v600_v5 }
  0x1d   :  { %279 = vmatpush.bf16.msra.mxu1 %v609_v36 }
  0x1e   :  { %140 = vmatpush.bf16.msra.mxu0 %v599_v6  ;;  %628 = vmatpush.bf16.msra.mxu3 %v599_v6 }
  0x21   :  { %280 = vmatpush.bf16.msra.mxu1 %v608_v37 }
  0x22   :  { %141 = vmatpush.bf16.msra.mxu0 %v598_v7  ;;  %629 = vmatpush.bf16.msra.mxu3 %v598_v7 }
  0x25   :  { %142 = vmatmul.bf16.vlgmr.msra.gmra.mxu0 %v75_v12  ;;  %172 = vmatmul.bf16.vlgmr.msra.gmra.mxu3 %v81_v13 }
  0x26   :  { %630 = vmatpush.bf16.msrb.mxu3 %v613_v26  ;;  %281 = vmatpush.bf16.msra.mxu1 %v607_v38  ;;  %v618_v26 = vld [vmem:[#allocation2 + $0x20] sm:$0xff] }
  0x2a   :  { %631 = vmatpush.bf16.msrb.mxu3 %v612_v27  ;;  %282 = vmatpush.bf16.msra.mxu1 %v606_v39 }
  0x2e   :  { %632 = vmatpush.bf16.msrb.mxu3 %v611_v28 }
  0x32   :  { %633 = vmatpush.bf16.msrb.mxu3 %v610_v31 }
  0x35   :  { %147 = vmatmul.bf16.gmra.mxu0 %v76_v18  ;;  %177 = vmatmul.bf16.gmra.mxu3 %v82_v19  ;;  %v621_v19 = vld [vmem:[#allocation2 + $0x38] sm:$0xff] }
  0x36   :  { %634 = vmatpush.bf16.msrb.mxu3 %v609_v36  ;;  %416 = vmatpush.bf16.msra.mxu2 %v621_v19 }
  0x3a   :  { %635 = vmatpush.bf16.msrb.mxu3 %v608_v37  ;;  %417 = vmatpush.bf16.msra.mxu2 %v620_v21  ;;  %v617_v37 = vld [vmem:[#allocation2 + $0x18] sm:$0xff] }
  0x3e   :  { %636 = vmatpush.bf16.msrb.mxu3 %v607_v38  ;;  %v616_v38 = vld [vmem:[#allocation2 + $0x10] sm:$0xff] }
  0x42   :  { %637 = vmatpush.bf16.msrb.mxu3 %v606_v39  ;;  %v615_v39 = vld [vmem:[#allocation2 + $0x8] sm:$0xff] }
  0x45   :  { %152 = vmatmul.bf16.gmra.mxu0 %v77_v22  ;;  %v619_v22 = vld [vmem:[#allocation2 + $0x28] sm:$0xff] }
  0x46   :  { %638 = vmatpush.bf16.msra.mxu3 %v621_v19  ;;  %418 = vmatpush.bf16.msra.mxu2 %v619_v22 }
  0x4a   :  { %639 = vmatpush.bf16.msra.mxu3 %v620_v21  ;;  %419 = vmatpush.bf16.msra.mxu2 %v618_v26 }
  0x4e   :  { %640 = vmatpush.bf16.msra.mxu3 %v619_v22  ;;  %420 = vmatpush.bf16.msra.mxu2 %v617_v37 }
  0x52   :  { %641 = vmatpush.bf16.msra.mxu3 %v618_v26  ;;  %421 = vmatpush.bf16.msra.mxu2 %v616_v38 }
  0x55   :  { %157 = vmatmul.bf16.gmra.mxu0 %v78_v25 }
  0x56   :  { %642 = vmatpush.bf16.msra.mxu3 %v617_v37  ;;  %422 = vmatpush.bf16.msra.mxu2 %v615_v39 }
  0x5a   :  { %643 = vmatpush.bf16.msra.mxu3 %v616_v38 }
  0x5e   :  { %644 = vmatpush.bf16.msra.mxu3 %v615_v39 }
  0x65   :  { %162 = vmatmul.bf16.gmra.mxu0 %v79_v32 }
  0x75   :  { %167 = vmatmul.bf16.gmra.mxu0 %v80_v35 }
  0xa2   :  { %v143_v40 = vpop.f32.mrf.mxu0 }
  0xa3   :  { %v144_v43 = vadd.f32 %v823_v41, %v143_v40  ;;  %v614_v40 = vld [vmem:[#allocation2] sm:$0xff] }
  0xa4   :  { %423 = vmatpush.bf16.msra.mxu2 %v614_v40  ;;  %645 = vmatpush.bf16.msra.mxu3 %v614_v40 }
  0xa5   :  { %v183_v46 = vmax.f32 %v144_v43, 0.0 }
  0xa8   :  { %v173_v42 = vpop.f32.mrf.mxu3 }
  0xa9   :  { %v174_v48 = vadd.f32 %v823_v41, %v173_v42 }
  0xaa   :  { %v145_v44 = vpop.f32.mrf.mxu0 }
  0xab   :  { %v146_v45 = vadd.f32 %v823_v41, %v145_v44  ;;  %v195_v51 = vmax.f32 %v174_v48, 0.0 }
  0xad   :  { %v184_v47 = vmax.f32 %v146_v45, 0.0 }
  0xaf   :  { %v216_v49 = vpack.c.bf16 %v184_v47, %v183_v46 }
  0xb0   :  { %v175_v50 = vpop.f32.mrf.mxu3 }
  0xb1   :  { %283 = vmatmul.bf16.vlgmr.msra.gmra.mxu1 %v216_v49  ;;  %v176_v52 = vadd.f32 %v823_v41, %v175_v50 }
  0xb2   :  { %v148_v53 = vpop.f32.mrf.mxu0 }
  0xb3   :  { %v196_v54 = vmax.f32 %v176_v52, 0.0  ;;  %v149_v57 = vadd.f32 %v823_v41, %v148_v53 }
  0xb5   :  { %v222_v55 = vpack.c.bf16 %v196_v54, %v195_v51  ;;  %v185_v60 = vmax.f32 %v149_v57, 0.0 }
  0xb7   :  { %313 = vmatmul.bf16.vlgmr.msrb.gmra.mxu3 %v222_v55 }
  0xb8   :  { %v178_v56 = vpop.f32.mrf.mxu3 }
  0xb9   :  { %v179_v62 = vadd.f32 %v823_v41, %v178_v56 }
  0xba   :  { %v150_v58 = vpop.f32.mrf.mxu0 }
  0xbb   :  { %v151_v59 = vadd.f32 %v823_v41, %v150_v58  ;;  %v197_v1 = vmax.f32 %v179_v62, 0.0 }
  0xbd   :  { %v186_v61 = vmax.f32 %v151_v59, 0.0 }
  0xbf   :  { %v217_v63 = vpack.c.bf16 %v186_v61, %v185_v60 }
  0xc0   :  { %v180_v0 = vpop.f32.mrf.mxu3 }
  0xc1   :  { %288 = vmatmul.bf16.gmra.mxu1 %v217_v63  ;;  %v181_v2 = vadd.f32 %v823_v41, %v180_v0 }
  0xc2   :  { %v153_v3 = vpop.f32.mrf.mxu0 }
  0xc3   :  { %v198_v4 = vmax.f32 %v181_v2, 0.0  ;;  %v154_v6 = vadd.f32 %v823_v41, %v153_v3 }
  0xc5   :  { %v223_v5 = vpack.c.bf16 %v198_v4, %v197_v1  ;;  %v187_v9 = vmax.f32 %v154_v6, 0.0 }
  0xc7   :  { %318 = vmatmul.bf16.gmra.mxu3 %v223_v5 }
  0xca   :  { %v155_v7 = vpop.f32.mrf.mxu0 }
  0xcb   :  { %v156_v8 = vadd.f32 %v823_v41, %v155_v7 }
  0xcd   :  { %v188_v10 = vmax.f32 %v156_v8, 0.0 }
  0xcf   :  { %v218_v11 = vpack.c.bf16 %v188_v10, %v187_v9 }
  0xd1   :  { %293 = vmatmul.bf16.gmra.mxu1 %v218_v11 }
  0xd2   :  { %v158_v12 = vpop.f32.mrf.mxu0 }
  0xd3   :  { %v159_v13 = vadd.f32 %v823_v41, %v158_v12 }
  0xd5   :  { %v189_v16 = vmax.f32 %v159_v13, 0.0 }
  0xda   :  { %v160_v14 = vpop.f32.mrf.mxu0 }
  0xdb   :  { %v161_v15 = vadd.f32 %v823_v41, %v160_v14 }
  0xdd   :  { %v190_v17 = vmax.f32 %v161_v15, 0.0 }
  0xdf   :  { %v219_v18 = vpack.c.bf16 %v190_v17, %v189_v16 }
  0xe1   :  { %298 = vmatmul.bf16.gmra.mxu1 %v219_v18 }
  0xe2   :  { %v163_v20 = vpop.f32.mrf.mxu0 }
  0xe3   :  { %v164_v23 = vadd.f32 %v823_v41, %v163_v20 }
  0xe5   :  { %v191_v27 = vmax.f32 %v164_v23, 0.0 }
  0xea   :  { %v165_v24 = vpop.f32.mrf.mxu0 }
  0xeb   :  { %v166_v25 = vadd.f32 %v823_v41, %v165_v24 }
  0xed   :  { %v192_v28 = vmax.f32 %v166_v25, 0.0 }
  0xef   :  { %v220_v29 = vpack.c.bf16 %v192_v28, %v191_v27 }
  0xf1   :  { %303 = vmatmul.bf16.gmra.mxu1 %v220_v29 }
  0xf2   :  { %v168_v30 = vpop.f32.mrf.mxu0 }
  0xf3   :  { %v169_v31 = vadd.f32 %v823_v41, %v168_v30 }
  0xf5   :  { %v193_v34 = vmax.f32 %v169_v31, 0.0 }
  0xfa   :  { %v170_v32 = vpop.f32.mrf.mxu0 }
  0xfb   :  { %v171_v33 = vadd.f32 %v823_v41, %v170_v32  ;;  %v650_v41 = vld [vmem:[%s899_s4] ss:$0 sm:$0xff] }
  0xfd   :  { %v194_v35 = vmax.f32 %v171_v33, 0.0 }
  0xff   :  { %v221_v36 = vpack.c.bf16 %v194_v35, %v193_v34  ;;  %v651_v34 = vld [vmem:[%s901_s6] ss:$0 sm:$0xff] }
 0x101   :  { %308 = vmatmul.bf16.gmra.mxu1 %v221_v36 }
 0x12e   :  { %v284_v42 = vpop.f32.mrf.mxu1 }
 0x12f   :  { %v285_v43 = vadd.f32 %v650_v41, %v284_v42 }
 0x131   :  { %v324_v46 = vmax.f32 %v285_v43, 0.0 }
 0x136   :  { %v286_v44 = vpop.f32.mrf.mxu1 }
 0x137   :  { %v287_v45 = vadd.f32 %v650_v41, %v286_v44 }
 0x139   :  { %v325_v47 = vmax.f32 %v287_v45, 0.0 }
 0x13a   :  { %v314_v48 = vpop.f32.mrf.mxu3 }
 0x13b   :  { %v357_v49 = vpack.c.bf16 %v325_v47, %v324_v46  ;;  %v315_v51 = vadd.f32 %v650_v41, %v314_v48 }
 0x13d   :  { %424 = vmatmul.bf16.vlgmr.msra.gmra.mxu2 %v357_v49  ;;  %v336_v53 = vmax.f32 %v315_v51, 0.0 }
 0x13e   :  { %v289_v50 = vpop.f32.mrf.mxu1 }
 0x13f   :  { %v290_v55 = vadd.f32 %v650_v41, %v289_v50 }
 0x141   :  { %v326_v60 = vmax.f32 %v290_v55, 0.0 }
 0x142   :  { %v316_v52 = vpop.f32.mrf.mxu3 }
 0x143   :  { %v317_v54 = vadd.f32 %v650_v41, %v316_v52 }
 0x145   :  { %v337_v56 = vmax.f32 %v317_v54, 0.0 }
 0x146   :  { %v291_v57 = vpop.f32.mrf.mxu1 }
 0x147   :  { %v292_v58 = vadd.f32 %v650_v41, %v291_v57  ;;  %v363_v59 = vpack.c.bf16 %v337_v56, %v336_v53 }
 0x149   :  { %v327_v61 = vmax.f32 %v292_v58, 0.0  ;;  %454 = vmatmul.bf16.vlgmr.msra.gmra.mxu3 %v363_v59 }
 0x14a   :  { %v319_v62 = vpop.f32.mrf.mxu3 }
 0x14b   :  { %v358_v63 = vpack.c.bf16 %v327_v61, %v326_v60  ;;  %v320_v1 = vadd.f32 %v650_v41, %v319_v62 }
 0x14d   :  { %429 = vmatmul.bf16.gmra.mxu2 %v358_v63  ;;  %v338_v3 = vmax.f32 %v320_v1, 0.0 }
 0x14e   :  { %v294_v0 = vpop.f32.mrf.mxu1 }
 0x14f   :  { %v295_v5 = vadd.f32 %v650_v41, %v294_v0 }
 0x151   :  { %v328_v10 = vmax.f32 %v295_v5, 0.0 }
 0x152   :  { %v321_v2 = vpop.f32.mrf.mxu3 }
 0x153   :  { %v322_v4 = vadd.f32 %v650_v41, %v321_v2 }
 0x155   :  { %v339_v6 = vmax.f32 %v322_v4, 0.0 }
 0x156   :  { %v296_v7 = vpop.f32.mrf.mxu1 }
 0x157   :  { %v297_v8 = vadd.f32 %v650_v41, %v296_v7  ;;  %v364_v9 = vpack.c.bf16 %v339_v6, %v338_v3 }
 0x159   :  { %v329_v11 = vmax.f32 %v297_v8, 0.0  ;;  %459 = vmatmul.bf16.gmra.mxu3 %v364_v9 }
 0x15b   :  { %v359_v12 = vpack.c.bf16 %v329_v11, %v328_v10 }
 0x15d   :  { %434 = vmatmul.bf16.gmra.mxu2 %v359_v12 }
 0x15e   :  { %v299_v13 = vpop.f32.mrf.mxu1 }
 0x15f   :  { %v300_v14 = vadd.f32 %v650_v41, %v299_v13 }
 0x161   :  { %v330_v17 = vmax.f32 %v300_v14, 0.0 }
 0x166   :  { %v301_v15 = vpop.f32.mrf.mxu1 }
 0x167   :  { %v302_v16 = vadd.f32 %v650_v41, %v301_v15 }
 0x169   :  { %v331_v18 = vmax.f32 %v302_v16, 0.0 }
 0x16b   :  { %v360_v19 = vpack.c.bf16 %v331_v18, %v330_v17 }
 0x16d   :  { %439 = vmatmul.bf16.gmra.mxu2 %v360_v19 }
 0x16e   :  { %v304_v20 = vpop.f32.mrf.mxu1 }
 0x16f   :  { %v305_v21 = vadd.f32 %v650_v41, %v304_v20 }
 0x171   :  { %v332_v24 = vmax.f32 %v305_v21, 0.0 }
 0x176   :  { %v306_v22 = vpop.f32.mrf.mxu1 }
 0x177   :  { %v307_v23 = vadd.f32 %v650_v41, %v306_v22 }
 0x179   :  { %v333_v25 = vmax.f32 %v307_v23, 0.0 }
 0x17b   :  { %v361_v26 = vpack.c.bf16 %v333_v25, %v332_v24 }
 0x17d   :  { %444 = vmatmul.bf16.gmra.mxu2 %v361_v26 }
 0x17e   :  { %v309_v27 = vpop.f32.mrf.mxu1 }
 0x17f   :  { %v310_v28 = vadd.f32 %v650_v41, %v309_v27 }
 0x181   :  { %v334_v31 = vmax.f32 %v310_v28, 0.0 }
 0x186   :  { %v311_v29 = vpop.f32.mrf.mxu1 }
 0x187   :  { %v312_v30 = vadd.f32 %v650_v41, %v311_v29 }
 0x189   :  { %v335_v32 = vmax.f32 %v312_v30, 0.0 }
 0x18b   :  { %v362_v33 = vpack.c.bf16 %v335_v32, %v334_v31 }
 0x18d   :  { %449 = vmatmul.bf16.gmra.mxu2 %v362_v33 }
 0x1c0   :  { %v425_v35 = vpop.f32.mrf.mxu2 }
 0x1c1   :  { %v426_v36 = vadd.f32 %v651_v34, %v425_v35 }
 0x1c3   :  { %v465_v37 = vmax.f32 %v426_v36, 0.0 }
 0x1c5   :  { %481 = vst [vmem:[%s902_s7] sm:$0xff] %v465_v37 }
 0x1c8   :  { %v427_v38 = vpop.f32.mrf.mxu2 }
 0x1c9   :  { %v428_v39 = vadd.f32 %v651_v34, %v427_v38 }
 0x1cb   :  { %v466_v40 = vmax.f32 %v428_v39, 0.0 }
 0x1cc   :  { %v455_v42 = vpop.f32.mrf.mxu3 }
 0x1cd   :  { %482 = vst [vmem:[%s902_s7 + $0x8] sm:$0xff] %v466_v40  ;;  %v456_v41 = vadd.f32 %v651_v34, %v455_v42 }
 0x1cf   :  { %v477_v43 = vmax.f32 %v456_v41, 0.0 }
 0x1d0   :  { %v430_v44 = vpop.f32.mrf.mxu2 }
 0x1d1   :  { %v431_v45 = vadd.f32 %v651_v34, %v430_v44  ;;  %493 = vst [vmem:[%s902_s7 + $0x60] sm:$0xff] %v477_v43 }
 0x1d3   :  { %v467_v46 = vmax.f32 %v431_v45, 0.0 }
 0x1d4   :  { %v457_v47 = vpop.f32.mrf.mxu3 }
 0x1d5   :  { %483 = vst [vmem:[%s902_s7 + $0x10] sm:$0xff] %v467_v46  ;;  %v458_v48 = vadd.f32 %v651_v34, %v457_v47 }
 0x1d7   :  { %v478_v49 = vmax.f32 %v458_v48, 0.0 }
 0x1d8   :  { %v432_v50 = vpop.f32.mrf.mxu2 }
 0x1d9   :  { %v433_v51 = vadd.f32 %v651_v34, %v432_v50  ;;  %494 = vst [vmem:[%s902_s7 + $0x68] sm:$0xff] %v478_v49 }
 0x1db   :  { %v468_v52 = vmax.f32 %v433_v51, 0.0 }
 0x1dc   :  { %v460_v53 = vpop.f32.mrf.mxu3 }
 0x1dd   :  { %484 = vst [vmem:[%s902_s7 + $0x18] sm:$0xff] %v468_v52  ;;  %v461_v54 = vadd.f32 %v651_v34, %v460_v53 }
 0x1df   :  { %v479_v55 = vmax.f32 %v461_v54, 0.0 }
 0x1e0   :  { %v435_v56 = vpop.f32.mrf.mxu2 }
 0x1e1   :  { %v436_v57 = vadd.f32 %v651_v34, %v435_v56  ;;  %495 = vst [vmem:[%s902_s7 + $0x70] sm:$0xff] %v479_v55 }
 0x1e3   :  { %v469_v58 = vmax.f32 %v436_v57, 0.0 }
 0x1e4   :  { %v462_v59 = vpop.f32.mrf.mxu3 }
 0x1e5   :  { %485 = vst [vmem:[%s902_s7 + $0x20] sm:$0xff] %v469_v58  ;;  %v463_v60 = vadd.f32 %v651_v34, %v462_v59 }
 0x1e7   :  { %v480_v61 = vmax.f32 %v463_v60, 0.0 }
 0x1e8   :  { %v437_v62 = vpop.f32.mrf.mxu2 }
 0x1e9   :  { %v438_v63 = vadd.f32 %v651_v34, %v437_v62  ;;  %496 = vst [vmem:[%s902_s7 + $0x78] sm:$0xff] %v480_v61 }
 0x1eb   :  { %v470_v0 = vmax.f32 %v438_v63, 0.0 }
 0x1ed   :  { %486 = vst [vmem:[%s902_s7 + $0x28] sm:$0xff] %v470_v0 }
 0x1f0   :  { %v440_v1 = vpop.f32.mrf.mxu2 }
 0x1f1   :  { %v441_v2 = vadd.f32 %v651_v34, %v440_v1 }
 0x1f3   :  { %v471_v3 = vmax.f32 %v441_v2, 0.0 }
 0x1f5   :  { %487 = vst [vmem:[%s902_s7 + $0x30] sm:$0xff] %v471_v3 }
 0x1f8   :  { %v442_v4 = vpop.f32.mrf.mxu2 }
 0x1f9   :  { %v443_v5 = vadd.f32 %v651_v34, %v442_v4 }
 0x1fb   :  { %v472_v6 = vmax.f32 %v443_v5, 0.0 }
 0x1fd   :  { %488 = vst [vmem:[%s902_s7 + $0x38] sm:$0xff] %v472_v6 }
 0x200   :  { %v445_v7 = vpop.f32.mrf.mxu2 }
 0x201   :  { %v446_v8 = vadd.f32 %v651_v34, %v445_v7 }
 0x203   :  { %v473_v9 = vmax.f32 %v446_v8, 0.0 }
 0x205   :  { %489 = vst [vmem:[%s902_s7 + $0x40] sm:$0xff] %v473_v9 }
 0x208   :  { %v447_v10 = vpop.f32.mrf.mxu2 }
 0x209   :  { %v448_v11 = vadd.f32 %v651_v34, %v447_v10 }
 0x20b   :  { %v474_v12 = vmax.f32 %v448_v11, 0.0 }
 0x20d   :  { %490 = vst [vmem:[%s902_s7 + $0x48] sm:$0xff] %v474_v12 }
 0x210   :  { %v450_v13 = vpop.f32.mrf.mxu2 }
 0x211   :  { %v451_v14 = vadd.f32 %v651_v34, %v450_v13 }
 0x213   :  { %v475_v15 = vmax.f32 %v451_v14, 0.0 }
 0x215   :  { %491 = vst [vmem:[%s902_s7 + $0x50] sm:$0xff] %v475_v15 }
 0x218   :  { %v452_v16 = vpop.f32.mrf.mxu2 }
 0x219   :  { %v453_v17 = vadd.f32 %v651_v34, %v452_v16 }
 0x21b   :  { %v476_v18 = vmax.f32 %v453_v17, 0.0 }
 0x21d   :  { %492 = vst [vmem:[%s902_s7 + $0x58] sm:$0xff] %v476_v18 }
 0x21e   :  { %501 = vsyncpa [#allocation3], 1 }

</bundles_post_ra>
